<compile_context>
chip_gen: v5e
topology: v5e:2x2
jax: 0.10.0
libtpu: 0.0.40
codegen_flags: <defaults>
</compile_context>

<pallas_src>
import jax
import jax.numpy as jnp
from jax.experimental import pallas as pl
from jax.experimental.pallas import tpu as pltpu


def _relu_kernel(x_ref, o_ref):
    # Elementwise hot path: max(x, 0) on the current VMEM tile (VPU only).
    o_ref[...] = jnp.maximum(x_ref[...], jnp.zeros((), x_ref.dtype))


def _target_block_bytes() -> int:
    """Per-generation target size (bytes) of one input tile."""
    try:
        kind = jax.devices()[0].device_kind.lower()
    except Exception:
        return 2 * 1024 * 1024
    if "v7" in kind:
        # v7x: bigger tiles halve the relative per-step overhead vs 3.2 TB/s
        # HBM; 4 MiB x (in+out) x 2 buffers = 16 MiB << 32 MiB scoped default.
        return 4 * 1024 * 1024
    # v5e must stay under its 16 MiB scoped-VMEM default; v6e is already near
    # the HBM roofline at ~2 MiB tiles.
    return 2 * 1024 * 1024


def _sublane_multiple(itemsize: int) -> int:
    # Packed sublane tile height: 8 for 4-byte, 16 for 2-byte, 32 for 1-byte.
    return 8 * max(1, 4 // itemsize)


def _choose_lane(n: int) -> int:
    for lane in (1024, 512, 256, 128):
        if n % lane == 0:
            return lane
    return 128  # unreachable: callers guarantee n % 128 == 0


def _choose_tile_rows(rows: int, lane: int, itemsize: int) -> int:
    sub = _sublane_multiple(itemsize)
    row_bytes = lane * itemsize
    target_rows = max(sub, (_target_block_bytes() // row_bytes) // sub * sub)
    if rows > target_rows:
        return target_rows  # ragged final block (if any) is masked by Pallas
    # Whole slab fits in one target block.  Split into two *equal* sublane-
    # multiple blocks when possible so both v7x TensorCores get balanced work
    # (a harmless extra grid step on single-core v5e/v6e).
    if rows >= 2 * sub and rows % (2 * sub) == 0:
        return rows // 2
    return rows  # full-extent block (legal even when rows < sub)


def _relu_2d(x_flat, n, dtype, itemsize, donate):
    """Lane-dense 2-D streaming pass for n % 128 == 0 (the common case)."""
    lane = _choose_lane(n)
    rows = n // lane
    tile_rows = _choose_tile_rows(rows, lane, itemsize)
    grid = (pl.cdiv(rows, tile_rows),)
    x2d = x_flat.reshape(rows, lane)

    out2d = pl.pallas_call(
        _relu_kernel,
        out_shape=jax.ShapeDtypeStruct((rows, lane), dtype),
        grid=grid,
        in_specs=[pl.BlockSpec((tile_rows, lane), lambda i: (i, 0))],
        out_specs=pl.BlockSpec((tile_rows, lane), lambda i: (i, 0)),
        compiler_params=pltpu.CompilerParams(
            dimension_semantics=("parallel",),
        ),
        input_output_aliases={0: 0} if donate else {},
        cost_estimate=pl.CostEstimate(
            flops=n, transcendentals=0, bytes_accessed=2 * n * itemsize),
    )(x2d)
    return out2d.reshape(n)


def _relu_1d(x_flat, n, dtype, itemsize, donate):
    """Full-coverage 1-D pass for ragged n (n % 128 != 0): no wrapper-side
    slice/pad/concatenate copies; the ragged last block is masked by Pallas."""
    vreg_elems = _sublane_multiple(itemsize) * 128  # one fully packed vreg
    target_elems = max(
        vreg_elems,
        (_target_block_bytes() // itemsize) // vreg_elems * vreg_elems)

    ce = pl.CostEstimate(flops=n, transcendentals=0,
                         bytes_accessed=2 * n * itemsize)

    if target_elems >= n:
        # Whole array fits in one (small) block: simplest whole-array call.
        return pl.pallas_call(
            _relu_kernel,
            out_shape=jax.ShapeDtypeStruct((n,), dtype),
            input_output_aliases={0: 0} if donate else {},
            cost_estimate=ce,
        )(x_flat)

    block = target_elems  # multiple of a packed vreg; last grid block ragged
    grid = (pl.cdiv(n, block),)
    return pl.pallas_call(
        _relu_kernel,
        out_shape=jax.ShapeDtypeStruct((n,), dtype),
        grid=grid,
        in_specs=[pl.BlockSpec((block,), lambda i: (i,))],
        out_specs=pl.BlockSpec((block,), lambda i: (i,)),
        compiler_params=pltpu.CompilerParams(
            dimension_semantics=("parallel",),
        ),
        input_output_aliases={0: 0} if donate else {},
        cost_estimate=ce,
    )(x_flat)


def relu(x: jax.Array, *, donate: bool = False) -> jax.Array:
    """ReLU with the same semantics as torch.nn.functional.relu(x).

    donate=True adds input_output_aliases={0: 0} (in-place over the input
    slab).  Only set it when the input buffer is a dead temporary inside the
    same jit; on a live / non-donated input XLA inserts a defensive full copy,
    which is why it is off by default.
    """
    orig_shape = x.shape
    dtype = x.dtype
    n = x.size

    if n == 0:
        return x
    if n < 128:
        # Tiny input: kernel-launch overhead dominates; plain elementwise max
        # is already minimal-traffic here.
        return jnp.maximum(x, jnp.zeros((), dtype))

    x_flat = x.reshape(-1)
    itemsize = jnp.dtype(dtype).itemsize

    if n % 128 == 0:
        out = _relu_2d(x_flat, n, dtype, itemsize, donate)
    else:
        out = _relu_1d(x_flat, n, dtype, itemsize, donate)
    return out.reshape(orig_shape)


if __name__ == "__main__":
    key = jax.random.PRNGKey(0)

    # Small NCHW input consistent with a conv-net activation (aligned path).
    x = jax.random.normal(key, (2, 4, 16, 16), dtype=jnp.float32)
    y = relu(x)
    jax.block_until_ready(y)
    y_ref = jnp.maximum(x, 0.0)
    assert y.shape == x.shape and y.dtype == x.dtype
    assert bool(jnp.all(y == y_ref))

    # Ragged path (n = 300, not a multiple of 128): full kernel coverage,
    # no wrapper-side concatenate.
    x2 = jax.random.normal(jax.random.PRNGKey(1), (2, 3, 50), dtype=jnp.float32)
    y2 = relu(x2)
    jax.block_until_ready(y2)
    assert bool(jnp.all(y2 == jnp.maximum(x2, 0.0)))

    # bf16 input exercises the packed-sublane (16-row) tiling rule.
    x3 = jax.random.normal(jax.random.PRNGKey(2), (4, 8, 128), dtype=jnp.bfloat16)
    y3 = relu(x3)
    jax.block_until_ready(y3)
    assert y3.dtype == x3.dtype
    assert bool(jnp.all(y3 == jnp.maximum(x3, jnp.zeros((), jnp.bfloat16))))

    print("KERNEL_OK")
</pallas_src>

<mosaic_0001>
module attributes {stable_mosaic.version = 11 : i64} {
  func.func @_relu_kernel(%arg0: i32, %arg1: memref<2x1024xf32, #tpu.memory_space<vmem>>, %arg2: memref<2x1024xf32, #tpu.memory_space<vmem>>) attributes {dimension_semantics = [#tpu.dimension_semantics<parallel>], iteration_bounds = array<i64: 1>, scalar_prefetch = 0 : i64, scratch_operands = 0 : i64, tpu.core_type = #tpu.core_type<tc>, window_params = [{transform_indices = @transform_0, window_bounds = array<i64: 2, 1024>}, {transform_indices = @transform_1, window_bounds = array<i64: 2, 1024>}]} {
    %c0 = arith.constant 0 : index
    %c0_0 = arith.constant 0 : index
    %0 = vector.load %arg1[%c0, %c0_0] : memref<2x1024xf32, #tpu.memory_space<vmem>>, vector<2x1024xf32>
    %cst = arith.constant 0.000000e+00 : f32
    %1 = vector.broadcast %cst : f32 to vector<2x1024xf32>
    %2 = arith.maximumf %0, %1 : vector<2x1024xf32>
    %c0_1 = arith.constant 0 : index
    %c0_2 = arith.constant 0 : index
    %3 = vector.load %arg2[%c0_1, %c0_2] : memref<2x1024xf32, #tpu.memory_space<vmem>>, vector<2x1024xf32>
    tpu.vector_store %arg2[%c0_1, %c0_2], %2 {strides = array<i32>} : memref<2x1024xf32, #tpu.memory_space<vmem>>, vector<2x1024xf32>,
    return
  }
  func.func @transform_0(%arg0: i32) -> (i32, i32) {
    %c0_i32 = arith.constant 0 : i32
    %c0_i32_0 = arith.constant 0 : i32
    return %arg0, %c0_i32 : i32, i32
  }
  func.func @transform_1(%arg0: i32) -> (i32, i32) {
    %c0_i32 = arith.constant 0 : i32
    %c0_i32_0 = arith.constant 0 : i32
    return %arg0, %c0_i32 : i32, i32
  }
}

</mosaic_0001>

<bundles_post_ra>
// kernel: tpu_custom_call.1
= control target key start
LH: loop header
LB: loop body
LE: loop exit
PB: predicated region body
PF: predicated region fallthrough
CT: control target
= control target key end

     0   :  { %6 = vsyncpa [#allocation3], 0  ;;  %s118_s0 = inlined_call_operand.hbm [shape: f32[2,1024], index: 0, kind: input, shape index: {}]   ;;  %s119_s1 = inlined_call_operand.hbm [shape: f32[2,1024], index: 1, kind: output, shape index: {}]  }
   0x1   :  { %7 = vsyncpa [#allocation4], 0  ;;  %s13_s8 = sshll.u32 %s118_s0, 4  ;;  %s100_s9 = smov [#allocation2]   ;;  %s14_s8 = int_to_ptr.hbm [resolvable:$true] %s13_s8 }
   0x2   :  { %s15_s10 = sshll.u32 %s100_s9, 4  ;;  %s16_s10 = int_to_ptr.vmem [resolvable:$true] %s15_s10 }
   0x3   :  { %18 = dma.hbm_to_vmem [thread:$0]  %s14_s8, 256, %s16_s10, [#allocation3]  }
   0x4   :  { %96 = dma.done.wait [#allocation3], 256  }
   0x5   :  { %97 = vsyncadd [#allocation3], 4294967040  ;;  %s101_s11 = smov [#allocation5]   ;;  %s36_s15 = sshll.u32 %s119_s1, 4  ;;  %v23_v0 = vld [vmem:[#allocation2] sm:$0xff]  ;;  %v24_v1 = vld [vmem:[#allocation2 + $0x8] sm:$0xff]  ;;  %s37_s15 = int_to_ptr.hbm [resolvable:$true] %s36_s15 }
   0x6   :  { %s34_s12 = sshll.u32 %s101_s11, 4  ;;  %v25_v2 = vmax.f32 %v23_v0, 0.0  ;;  %v26_v3 = vmax.f32 %v24_v1, 0.0  ;;  %s35_s12 = int_to_ptr.vmem [resolvable:$true] %s34_s12 }
   0x8   :  { %27 = vst [vmem:[#allocation5] sm:$0xff] %v25_v2 }
   0x9   :  { %28 = vst [vmem:[#allocation5 + $0x8] sm:$0xff] %v26_v3 }
   0xa   :  { %39 = dma.vmem_to_hbm [thread:$0]  %s35_s12, 256, %s37_s15, [#allocation4]  }
   0xb   :  { %98 = dma.done.wait [#allocation4], 256  }
   0xc   :  { %99 = vsyncadd [#allocation4], 4294967040 }
   0xd   :  { %44 = vsyncpa [#allocation3], 1 }
   0xe   :  { %45 = vsyncpa [#allocation4], 1 }

</bundles_post_ra>
